<compile_context>
chip_gen: v7x
topology: tpu7x:2x2x1
jax: 0.10.0
libtpu: 0.0.40
codegen_flags: <defaults>
</compile_context>

<pallas_src>
import math

import jax
import jax.numpy as jnp
from jax.experimental import pallas as pl
from jax.experimental.pallas import tpu as pltpu


def _round_up(x, m):
    return (x + m - 1) // m * m


def _cdiv(a, b):
    return -(-a // b)


# ---------------------------------------------------------------------------
# Pallas kernel: fused   feat = x @ Wb + bb ;  y = feat @ Wf + bf
# One row tile of x per grid step; weights/biases stay VMEM-resident across
# steps (constant index_maps).  bf16 MXU operands, f32 accumulation/epilogue
# (v5e has no bf16 VPU path).
# ---------------------------------------------------------------------------
def _vit_head_kernel(x_ref, wb_ref, bb_ref, wf_ref, bf_ref, feat_ref, y_ref):
    x = x_ref[...]
    if x.dtype != wb_ref.dtype:
        # fold the f32 -> bf16 cast into the kernel (hidden under MXU/DMA)
        x = x.astype(wb_ref.dtype)

    # bottleneck: Linear(F -> Dbn)
    feat = jnp.dot(x, wb_ref[...], preferred_element_type=jnp.float32)
    feat = feat + bb_ref[...]                         # f32 epilogue
    feat_ref[...] = feat.astype(feat_ref.dtype)       # bf16 store

    # classifier: Linear(Dbn -> Cpad)
    y = jnp.dot(feat.astype(wf_ref.dtype), wf_ref[...],
                preferred_element_type=jnp.float32)
    y = y + bf_ref[...]
    y_ref[...] = y.astype(y_ref.dtype)


def _choose_row_tiling(B, row_tile):
    """Row tiles: multiples of 16 (bf16 packing); even tile count >= 2 when the
    batch allows, so v7x's two TensorCores split the 'parallel' axis evenly."""
    n_tiles = max(1, _cdiv(B, max(16, _round_up(row_tile, 16))))
    if B > 16:
        n_tiles = max(2, n_tiles)
    if n_tiles > 1 and n_tiles % 2:
        n_tiles += 1
    tb = max(16, _round_up(_cdiv(B, n_tiles), 16))
    b_pad = n_tiles * tb
    return tb, n_tiles, b_pad


def vit_head(x, wb, bb, wf, bf, *, class_num=None, unpad_logits=False,
             row_tile=128, feat_dtype=jnp.bfloat16, logits_dtype=jnp.float32):
    """x:[B,F] (f32 or, better, bf16)   wb:[F,Dbn] bf16   bb:[1,Dbn] f32
    wf:[Dbn,Cpad] bf16   bf:[1,Cpad] f32
    Returns (feat:[B,Dbn] feat_dtype, y:[B,Cpad] logits_dtype).  The padded
    logit columns (>= class_num) are exact zeros; set unpad_logits=True to get
    exactly [B, class_num] (costs an extra copy pass)."""
    B, F = x.shape
    Dbn = wb.shape[1]
    Cpad = wf.shape[1]

    tb, n_tiles, b_pad = _choose_row_tiling(B, row_tile)
    if b_pad != B:
        # only pay the pad pass when the batch isn't already a tile multiple
        x = jnp.pad(x, ((0, b_pad - B), (0, 0)))

    flops = 2 * b_pad * (F * Dbn + Dbn * Cpad)
    bytes_accessed = (
        b_pad * F * x.dtype.itemsize
        + wb.size * wb.dtype.itemsize + bb.size * bb.dtype.itemsize
        + wf.size * wf.dtype.itemsize + bf.size * bf.dtype.itemsize
        + b_pad * Dbn * jnp.dtype(feat_dtype).itemsize
        + b_pad * Cpad * jnp.dtype(logits_dtype).itemsize)

    feat, y = pl.pallas_call(
        _vit_head_kernel,
        out_shape=(
            jax.ShapeDtypeStruct((b_pad, Dbn), feat_dtype),
            jax.ShapeDtypeStruct((b_pad, Cpad), logits_dtype),
        ),
        grid_spec=pltpu.PrefetchScalarGridSpec(
            num_scalar_prefetch=0,
            grid=(n_tiles,),
            in_specs=[
                pl.BlockSpec((tb, F), lambda i: (i, 0)),      # x tile advances
                pl.BlockSpec((F, Dbn), lambda i: (0, 0)),     # weights resident
                pl.BlockSpec((1, Dbn), lambda i: (0, 0)),
                pl.BlockSpec((Dbn, Cpad), lambda i: (0, 0)),
                pl.BlockSpec((1, Cpad), lambda i: (0, 0)),
            ],
            out_specs=[
                pl.BlockSpec((tb, Dbn), lambda i: (i, 0)),
                pl.BlockSpec((tb, Cpad), lambda i: (i, 0)),
            ],
        ),
        compiler_params=pltpu.CompilerParams(
            dimension_semantics=("parallel",),   # v7x: two TCs split the rows
            vmem_limit_bytes=32 * 1024 * 1024,
        ),
        cost_estimate=pl.CostEstimate(
            flops=flops, transcendentals=0, bytes_accessed=bytes_accessed),
    )(x, wb, bb, wf, bf)

    if b_pad != B:
        feat = feat[:B]
        y = y[:B]
    if unpad_logits and class_num is not None and class_num != Cpad:
        y = y[:, :class_num]                      # extra copy pass; opt-in only
    return feat, y


# ---------------------------------------------------------------------------
# Deterministic parameter init (mirrors init_weights for Linear:
# xavier_normal_ on weights, zeros_ on bias).  Weights stored transposed
# ([in, out]) in bf16, with the class dim zero-padded to a multiple of 128 so
# the logits store is lane-dense (padded columns -> exact-zero logits).
# ---------------------------------------------------------------------------
def _xavier_normal(key, fan_in, fan_out):
    std = math.sqrt(2.0 / (fan_in + fan_out))
    return std * jax.random.normal(key, (fan_in, fan_out), dtype=jnp.float32)


def make_params(key, feature_dim=2048, bottleneck_dim=256, class_num=1000,
                param_dtype=jnp.bfloat16):
    c_pad = _round_up(class_num, 128)
    k1, k2 = jax.random.split(key)
    wb = _xavier_normal(k1, feature_dim, bottleneck_dim).astype(param_dtype)
    bb = jnp.zeros((1, bottleneck_dim), jnp.float32)
    wf_f32 = _xavier_normal(k2, bottleneck_dim, class_num)
    wf = jnp.pad(wf_f32, ((0, 0), (0, c_pad - class_num))).astype(param_dtype)
    bf = jnp.zeros((1, c_pad), jnp.float32)
    return wb, bb, wf, bf


if __name__ == "__main__":
    key = jax.random.PRNGKey(0)
    k_x, k_p = jax.random.split(key)

    # Small shapes consistent with the module (feature dim -> bottleneck ->
    # classes); full-size would be F=2048, Dbn=256, C=1000.
    B, F, DBN, C = 32, 256, 128, 100

    # Backbone (ViT_seg) output stand-in — see TODO at top of file.
    x = jax.random.normal(k_x, (B, F), dtype=jnp.float32)
    wb, bb, wf, bf = make_params(k_p, F, DBN, C)
    Cpad = wf.shape[1]

    feat, y = vit_head(x, wb, bb, wf, bf, class_num=C)
    jax.block_until_ready((feat, y))

    assert feat.shape == (B, DBN) and feat.dtype == jnp.bfloat16
    assert y.shape == (B, Cpad) and y.dtype == jnp.float32

    # plain-JAX reference with matching numerics (bf16 operands, f32 accum)
    xb = x.astype(jnp.bfloat16).astype(jnp.float32)
    feat_f32 = xb @ wb.astype(jnp.float32) + bb
    feat_ref = feat_f32.astype(jnp.bfloat16)
    y_ref = feat_ref.astype(jnp.float32) @ wf.astype(jnp.float32) + bf

    assert jnp.allclose(feat.astype(jnp.float32), feat_ref.astype(jnp.float32),
                        atol=5e-2, rtol=5e-2)
    assert jnp.allclose(y, y_ref, atol=5e-2, rtol=5e-2)
    # padded logit columns are exact zeros (zero weight columns + zero bias)
    assert bool(jnp.all(y[:, C:] == 0.0))

    print("KERNEL_OK")
</pallas_src>

<mosaic_0001>
module attributes {stable_mosaic.version = 11 : i64} {
  func.func @_vit_head_kernel(%arg0: i32, %arg1: memref<16x256xf32, #tpu.memory_space<vmem>>, %arg2: memref<256x128xbf16, #tpu.memory_space<vmem>>, %arg3: memref<1x128xf32, #tpu.memory_space<vmem>>, %arg4: memref<128x128xbf16, #tpu.memory_space<vmem>>, %arg5: memref<1x128xf32, #tpu.memory_space<vmem>>, %arg6: memref<16x128xbf16, #tpu.memory_space<vmem>>, %arg7: memref<16x128xf32, #tpu.memory_space<vmem>>) attributes {dimension_semantics = [#tpu.dimension_semantics<parallel>], iteration_bounds = array<i64: 2>, scalar_prefetch = 0 : i64, scratch_operands = 0 : i64, tpu.core_type = #tpu.core_type<tc>, window_params = [{transform_indices = @transform_0, window_bounds = array<i64: 16, 256>}, {pipeline_mode = #tpu.pipeline_mode<synchronous>, transform_indices = @transform_1, window_bounds = array<i64: 256, 128>}, {pipeline_mode = #tpu.pipeline_mode<synchronous>, transform_indices = @transform_2, window_bounds = array<i64: 1, 128>}, {pipeline_mode = #tpu.pipeline_mode<synchronous>, transform_indices = @transform_3, window_bounds = array<i64: 128, 128>}, {pipeline_mode = #tpu.pipeline_mode<synchronous>, transform_indices = @transform_4, window_bounds = array<i64: 1, 128>}, {transform_indices = @transform_5, window_bounds = array<i64: 16, 128>}, {transform_indices = @transform_6, window_bounds = array<i64: 16, 128>}]} {
    %c0 = arith.constant 0 : index
    %c0_0 = arith.constant 0 : index
    %0 = vector.load %arg1[%c0, %c0_0] : memref<16x256xf32, #tpu.memory_space<vmem>>, vector<16x256xf32>
    %1 = arith.truncf %0 : vector<16x256xf32> to vector<16x256xbf16>
    %c0_1 = arith.constant 0 : index
    %c0_2 = arith.constant 0 : index
    %2 = vector.load %arg2[%c0_1, %c0_2] : memref<256x128xbf16, #tpu.memory_space<vmem>>, vector<256x128xbf16>
    %cst = arith.constant dense<0.000000e+00> : vector<16x128xf32>
    %3 = tpu.matmul %1, %2, %cst {dimension_numbers = #tpu.dot_dimension_numbers<[1], [0], [0], [1], [0, 0, 1, 1], [], []>} : vector<16x256xbf16>, vector<256x128xbf16>, vector<16x128xf32> -> vector<16x128xf32>
    %c0_3 = arith.constant 0 : index
    %c0_4 = arith.constant 0 : index
    %4 = vector.load %arg3[%c0_3, %c0_4] : memref<1x128xf32, #tpu.memory_space<vmem>>, vector<1x128xf32>
    %5 = vector.broadcast %4 : vector<1x128xf32> to vector<16x128xf32>
    %6 = arith.addf %3, %5 : vector<16x128xf32>
    %7 = arith.truncf %6 : vector<16x128xf32> to vector<16x128xbf16>
    %c0_5 = arith.constant 0 : index
    %c0_6 = arith.constant 0 : index
    %8 = vector.load %arg6[%c0_5, %c0_6] : memref<16x128xbf16, #tpu.memory_space<vmem>>, vector<16x128xbf16>
    tpu.vector_store %arg6[%c0_5, %c0_6], %7 {strides = array<i32>} : memref<16x128xbf16, #tpu.memory_space<vmem>>, vector<16x128xbf16>,
    %9 = arith.truncf %6 : vector<16x128xf32> to vector<16x128xbf16>
    %c0_7 = arith.constant 0 : index
    %c0_8 = arith.constant 0 : index
    %10 = vector.load %arg4[%c0_7, %c0_8] : memref<128x128xbf16, #tpu.memory_space<vmem>>, vector<128x128xbf16>
    %cst_9 = arith.constant dense<0.000000e+00> : vector<16x128xf32>
    %11 = tpu.matmul %9, %10, %cst_9 {dimension_numbers = #tpu.dot_dimension_numbers<[1], [0], [0], [1], [0, 0, 1, 1], [], []>} : vector<16x128xbf16>, vector<128x128xbf16>, vector<16x128xf32> -> vector<16x128xf32>
    %c0_10 = arith.constant 0 : index
    %c0_11 = arith.constant 0 : index
    %12 = vector.load %arg5[%c0_10, %c0_11] : memref<1x128xf32, #tpu.memory_space<vmem>>, vector<1x128xf32>
    %13 = vector.broadcast %12 : vector<1x128xf32> to vector<16x128xf32>
    %14 = arith.addf %11, %13 : vector<16x128xf32>
    %c0_12 = arith.constant 0 : index
    %c0_13 = arith.constant 0 : index
    %15 = vector.load %arg7[%c0_12, %c0_13] : memref<16x128xf32, #tpu.memory_space<vmem>>, vector<16x128xf32>
    tpu.vector_store %arg7[%c0_12, %c0_13], %14 {strides = array<i32>} : memref<16x128xf32, #tpu.memory_space<vmem>>, vector<16x128xf32>,
    return
  }
  func.func @transform_0(%arg0: i32) -> (i32, i32) {
    %c0_i32 = arith.constant 0 : i32
    %c0_i32_0 = arith.constant 0 : i32
    return %arg0, %c0_i32 : i32, i32
  }
  func.func @transform_1(%arg0: i32) -> (i32, i32) {
    %c0_i32 = arith.constant 0 : i32
    %c0_i32_0 = arith.constant 0 : i32
    %c0_i32_1 = arith.constant 0 : i32
    return %c0_i32, %c0_i32_0 : i32, i32
  }
  func.func @transform_2(%arg0: i32) -> (i32, i32) {
    %c0_i32 = arith.constant 0 : i32
    %c0_i32_0 = arith.constant 0 : i32
    %c0_i32_1 = arith.constant 0 : i32
    return %c0_i32, %c0_i32_0 : i32, i32
  }
  func.func @transform_3(%arg0: i32) -> (i32, i32) {
    %c0_i32 = arith.constant 0 : i32
    %c0_i32_0 = arith.constant 0 : i32
    %c0_i32_1 = arith.constant 0 : i32
    return %c0_i32, %c0_i32_0 : i32, i32
  }
  func.func @transform_4(%arg0: i32) -> (i32, i32) {
    %c0_i32 = arith.constant 0 : i32
    %c0_i32_0 = arith.constant 0 : i32
    %c0_i32_1 = arith.constant 0 : i32
    return %c0_i32, %c0_i32_0 : i32, i32
  }
  func.func @transform_5(%arg0: i32) -> (i32, i32) {
    %c0_i32 = arith.constant 0 : i32
    %c0_i32_0 = arith.constant 0 : i32
    return %arg0, %c0_i32 : i32, i32
  }
  func.func @transform_6(%arg0: i32) -> (i32, i32) {
    %c0_i32 = arith.constant 0 : i32
    %c0_i32_0 = arith.constant 0 : i32
    return %arg0, %c0_i32 : i32, i32
  }
}

</mosaic_0001>

<bundles_post_ra>
// kernel: tpu_custom_call.1
= control target key start
LH: loop header
LB: loop body
LE: loop exit
PB: predicated region body
PF: predicated region fallthrough
CT: control target
= control target key end

     0   :  { %12 = vsyncpa [#allocation3], 0  ;;  %s1528_s0 = inlined_call_operand.hbm [shape: f32[32,256], index: 0, kind: input, shape index: {}]   ;;  %s1529_s1 = inlined_call_operand.hbm [shape: bf16[256,128], index: 1, kind: input, shape index: {}]   ;;  %s1530_s2 = inlined_call_operand.vmem [shape: f32[1,128], index: 2, kind: input, shape index: {}]   ;;  %s1531_s3 = inlined_call_operand.hbm [shape: bf16[128,128], index: 3, kind: input, shape index: {}]   ;;  %s1532_s4 = inlined_call_operand.vmem [shape: f32[1,128], index: 4, kind: input, shape index: {}]   ;;  %s1533_s5 = inlined_call_operand.hbm [shape: bf16[32,128], index: 5, kind: output, shape index: {0}]   ;;  %s1534_s6 = inlined_call_operand.hbm [shape: f32[32,128], index: 6, kind: output, shape index: {1}]  }
   0x1   :  { %14 = vsyncpa [#allocation3 + $0x1], 0 }
   0x2   :  { %15 = vsyncpa [#allocation6], 0 }
   0x3   :  { %16 = vsyncpa [#allocation4], 0 }
   0x4   :  { %18 = vsyncpa [#allocation4 + $0x1], 0 }
   0x5   :  { %19 = vsyncpa [#allocation10], 0 }
   0x6   :  { %21 = vsyncpa [#allocation10 + $0x1], 0  ;;  %s1239_s21 = smov 0   ;;  %s1241_s22 = smov 0  }
   0x7   :  { %s1243_s23 = smov 0   ;;  %s1245_s24 = smov 0  }
   0x8 LB: > { %s1260_s25 = sadd.s32 4294967295, %s1187_s24   ;;  %s780_s26 = sadd.s32 4294967294, %s1187_s24   ;;  %s1187_s24 = sphi %s1245_s24, %s1554_s24   ;;  %s1183_s23 = sphi %s1243_s23, %s1553_s23   ;;  %s1179_s22 = sphi %s1241_s22, %s1552_s22   ;;  %s1175_s21 = sphi %s1239_s21, %s1551_s21  }
   0x9   : > { %p47_p0 = scmp.ne.s32.totalorder %s1179_s22, %s1175_s21  ;;  %p1535_p1 = scmp.eq.s32.totalorder %s1260_s25, 0 }
   0xa   : > { %p161_p3 = scmp.eq.s32.totalorder %s780_s26, 1  ;;  %p781_p5 = scmp.ge.s32.totalorder %s1187_s24, 1 }
   0xb   : > { %p1269_p4 = por %p1535_p1, %p47_p0  ;;  %p194_p7 = scmp.lt.s32.totalorder %s1187_s24, 3 }
   0xc   : > { %p1274_p6 = por %p161_p3, %p47_p0  ;;  %s1189_s30 = smov [#allocation5]  }
   0xd   : > { %s1538_s27 = scalar_select %p1269_p4, 1, 0 }
   0xe   : > { %s1539_s28 = scalar_select %p1274_p6, 1, 0 }
   0xf   : > { %p1279_p8 = pnand %p781_p5, %p194_p7  ;;  %s206_s7 = sshll.u32 %s1189_s30, 4  ;;  %s1283_s7 = int_to_ptr.vmem [resolvable:$true] %s206_s7 }
  0x10   : > { %s1190_s9 = smov [#allocation7]   ;;  %s999_s13 = scalar_lea.hbm %s1529_s1, 2048 }
  0x11   : > { %p907_p9 = pneg %p1279_p8  ;;  %s222_s10 = sshll.u32 %s1190_s9, 4  ;;  %s1294_s10 = int_to_ptr.vmem [resolvable:$true] %s222_s10 }
  0x12   : > { %p1000_p12 = scmp.ne.s32.totalorder %s1529_s1, %s999_s13  ;;  %p1006_p5 = scmp.lt.u32.totalorder %s999_s13, %s1529_s1 }
  0x13   : > { %p1290_p11 = pnand %p907_p9, %p1535_p1 }
  0x15   : > { %p1001_p13 = pneg %p1290_p11 }
  0x17   : > { %p1002_p0 = pnand %p1001_p13, %p1000_p12 }
  0x19   : > { %p1003_p3 = pneg %p1002_p0 }
  0x1b   : > { %p1008_p7 = pnand %p1006_p5, %p1003_p3 }
  0x1d   : > { %1011 = shalt.err (!%p1008_p7)
}
  0x1e   : > { %s1012_s18 = scalar_lea.vmem %s1283_s7, 2048  ;;  %p1020_p2 = scmp.lt.s32.totalorder %s1283_s7, %s1283_s7 }
  0x1f   : > { %p1013_p9 = scmp.ne.s32.totalorder %s1283_s7, %s1012_s18  ;;  %p1021_p12 = scmp.lt.s32.totalorder %s1012_s18, %s1012_s18 }
  0x21   : > { %p1015_p10 = pnand %p1013_p9, %p1001_p13  ;;  %p1022_p0 = por %p1021_p12, %p1020_p2 }
  0x23   : > { %p1016_p1 = pneg %p1015_p10 }
  0x25   : > { %p1023_p6 = pnand %p1022_p0, %p1016_p1 }
  0x27   : > { %1026 = shalt.err (!%p1023_p6)
}
  0x28   : > { %s1191_s19 = smov 64   ;;  %s1192_s20 = smov 4  }
  0x29   : > { %910 = dma.hbm_to_vmem [thread:$0]  (!%p1290_p11), %s1529_s1, 2048, %s1283_s7, [#allocation6], %s1191_s19, %s1191_s19, %s1192_s20  }
  0x2a   : > { %s1027_s12 = scalar_lea.hbm %s1531_s3, 1024 }
  0x2b   : > { %p1028_p2 = scmp.ne.s32.totalorder %s1531_s3, %s1027_s12  ;;  %p1034_p10 = scmp.lt.u32.totalorder %s1027_s12, %s1531_s3 }
  0x2d   : > { %p1030_p1 = pnand %p1028_p2, %p1001_p13 }
  0x2f   : > { %p1031_p6 = pneg %p1030_p1 }
  0x31   : > { %p1036_p3 = pnand %p1034_p10, %p1031_p6 }
  0x33   : > { %1039 = shalt.err (!%p1036_p3)
}
  0x34   : > { %s1040_s7 = scalar_lea.vmem %s1294_s10, 1024  ;;  %p1048_p12 = scmp.lt.s32.totalorder %s1294_s10, %s1294_s10 }
  0x35   : > { %p1041_p5 = scmp.ne.s32.totalorder %s1294_s10, %s1040_s7  ;;  %p1049_p0 = scmp.lt.s32.totalorder %s1040_s7, %s1040_s7 }
  0x37   : > { %p1043_p7 = pnand %p1041_p5, %p1001_p13  ;;  %p1050_p2 = por %p1049_p0, %p1048_p12 }
  0x39   : > { %p1044_p9 = pneg %p1043_p7 }
  0x3b   : > { %p1051_p1 = pnand %p1050_p2, %p1044_p9 }
  0x3d   : > { %1054 = shalt.err (!%p1051_p1)
}
  0x3e   : > { %913 = dma.hbm_to_vmem [thread:$0]  (!%p1290_p11), %s1531_s3, 1024, %s1294_s10, [#allocation6], %s1191_s19, %s1191_s19, %s1192_s20  }
  0x3f   : > { %s1349_s26 = sadd.s32 1, %s1187_s24   ;;  %s34_s8 = sadd.s32 1, %s1183_s23 }
  0x40   : > { %s31_s30 = ssub.s32 %s1187_s24, %s1349_s26  ;;  %p41_p13 = scmp.ne.s32.totalorder %s1183_s23, %s1179_s22 }
  0x41   : > { %p32_p6 = scmp.eq.s32.totalorder %s31_s30, 0  ;;  %p42_p10 = scmp.eq.s32.totalorder %s1187_s24, 0 }
  0x42   : > { %p1542_p3 = scmp.eq.s32.totalorder %s1260_s25, 1  ;;  %p927_p7 = scmp.lt.s32.totalorder %s1187_s24, 2 }
  0x43   : > { %s1365_s11 = scalar_select %p32_p6, %s1183_s23, %s34_s8  }
  0x44   : > { %p1359_p5 = por %p1542_p3, %p41_p13  ;;  %p43_p9 = por %p42_p10, %p41_p13 }
  0x45   : > { %s239_s12 = sand.u32 1, %s1183_s23   ;;  %s832_s10 = sshll.u32 %s1187_s24, 9 }
  0x46   : > { %s1543_s9 = scalar_select %p1359_p5, 1, 0 }
  0x47   : > { %s785_s13 = sshll.u32 %s239_s12, 5  ;;  %s1372_s14 = scalar_lea.hbm %s1528_s0, %s832_s10 }
  0x48   : > { %s243_s15 = scalar_lea.vmem [#allocation2], %s785_s13  ;;  %p1376_p11 = pnand %p927_p7, %p43_p9 }
  0x49   : > { %s251_s16 = sshll.u32 %s243_s15, 4  ;;  %s1380_s17 = scalar_lea.sflag [#allocation3], %s239_s12  ;;  %s1374_s16 = int_to_ptr.vmem [resolvable:$true] %s251_s16 }
  0x4a   : > { %s1055_s18 = scalar_lea.hbm %s1372_s14, 512  ;;  %p1057_p0 = pneg %p1376_p11 }
  0x4b   : > { %p1056_p12 = scmp.ne.s32.totalorder %s1372_s14, %s1055_s18  ;;  %s1060_s13 = scalar_lea.hbm %s1528_s0, 1024 }
  0x4c   : > { %p1061_p13 = scmp.lt.u32.totalorder %s1372_s14, %s1528_s0  ;;  %p1062_p6 = scmp.lt.u32.totalorder %s1060_s13, %s1055_s18 }
  0x4d   : > { %p1058_p2 = pnand %p1057_p0, %p1056_p12  ;;  %p1064_p3 = scmp.lt.u32.totalorder %s1055_s18, %s1372_s14 }
  0x4e   : > { %p1063_p10 = por %p1062_p6, %p1061_p13 }
  0x4f   : > { %p1059_p1 = pneg %p1058_p2 }
  0x50   : > { %p1065_p7 = por %p1064_p3, %p1063_p10 }
  0x52   : > { %p1066_p9 = pnand %p1065_p7, %p1059_p1 }
  0x54   : > { %1069 = shalt.err (!%p1066_p9)
}
  0x55   : > { %s1070_s12 = scalar_lea.vmem %s1374_s16, 512  ;;  %s1193_s20 = smov [#allocation2]  }
  0x56   : > { %p1071_p12 = scmp.ne.s32.totalorder %s1374_s16, %s1070_s12  ;;  %s1075_s15 = sshll.u32 %s1193_s20, 4  ;;  %s1076_s15 = int_to_ptr.vmem [resolvable:$false] %s1075_s15 }
  0x57   : > { %s1077_s8 = scalar_lea.vmem %s1076_s15, 1024  ;;  %p1078_p4 = scmp.lt.s32.totalorder %s1374_s16, %s1076_s15 }
  0x58   : > { %p1073_p2 = pnand %p1071_p12, %p1057_p0  ;;  %p1079_p13 = scmp.lt.s32.totalorder %s1077_s8, %s1070_s12 }
  0x5a   : > { %p1074_p5 = pneg %p1073_p2  ;;  %p1080_p6 = por %p1079_p13, %p1078_p4 }
  0x5c   : > { %p1081_p10 = pnand %p1080_p6, %p1074_p5 }
  0x5e   : > { %1084 = shalt.err (!%p1081_p10)
}
  0x5f   : > { %s1194_s18 = smov 256   ;;  %s1195_s30 = smov 16  }
  0x60   : > { %917 = dma.hbm_to_vmem [thread:$0]  (!%p1376_p11), %s1372_s14, 512, %s1374_s16, %s1380_s17, %s1194_s18, %s1194_s18, %s1195_s30  }
  0x61   : > { %263 = sbr.rel (%p1279_p8) target bundleno = 593 (0x251), region = 40  ;;  %s1411_s13 = sand.u32 (!%p1279_p8), 1, %s1179_s22  }
  0x62   : > { %s790_s10 = sshll.u32 (!%p1279_p8), %s1411_s13, 5  ;;  %s266_s19 = scalar_lea.sflag (!%p1279_p8), [#allocation3], %s1411_s13 }
  0x63   : > { %s1415_s12 = scalar_lea.vmem (!%p1279_p8), [#allocation2], %s790_s10  ;;  %p1545_p4 = scmp.ne.s32.totalorder (!%p1279_p8), %s1538_s27, 0 }
  0x68   : > { %1158 = dma.done.wait (%p1545_p4), %s266_s19, 512  }
  0x69   : > { %1160 = vsyncadd (%p1545_p4), %s266_s19, 4294966784  ;;  %p1546_p5 = scmp.eq.s32.totalorder %s1260_s25, 0 }
  0x6b   : > { %1162 = dma.done.wait (%p1546_p5), [#allocation6], 3072   ;;  %p1547_p8 = pmov %p1546_p5 }
  0x6c   : > { %v1196_v0 = vmov 0.0   ;;  %v975_v1 = vld [vmem:[#allocation5 + $0x40] sm:$0xff]   ;;  %v977_v3 = vld [vmem:[#allocation5 + $0x48] sm:$0xff]   ;;  %v979_v5 = vld [vmem:[#allocation5 + $0x50] sm:$0xff]   ;;  %vm1197_vm0 = vmmov 0   ;;  %s793_s14 = sshll.u32 %s1411_s13, 3 }
  0x6d   : > { %1164 = vsyncadd (%p1547_p8), [#allocation6], 4294964224  ;;  %873 = vmatprep.subr.bf16.mxu1 %v1196_v0  ;;  %v976_v2 = vld [vmem:[#allocation5] sm:$0xff]   ;;  %842 = vmatprep.subr.bf16.mxu0 %v975_v1  ;;  %v978_v4 = vld [vmem:[#allocation5 + $0x8] sm:$0xff]   ;;  %s303_s16 = scalar_lea.vmem [#allocation8], %s793_s14  ;;  %s835_s17 = sshll.u32 %s1260_s25, 7 }
  0x6e   : > { %843 = vmatpush3.bf16.msra.mxu0 %v976_v2  ;;  %v980_v6 = vld [vmem:[#allocation5 + $0x10] sm:$0xff]   ;;  %v981_v7 = vld [vmem:[#allocation5 + $0x58] sm:$0xff]   ;;  %v983_v9 = vld [vmem:[#allocation5 + $0x60] sm:$0xff]   ;;  %889 = vmatprep.mubr.msk.bf16.mxu1 %vm1197_vm0, %v1196_v0  ;;  %s640_s7 = sshll.u32 %s303_s16, 4  ;;  %s1446_s8 = scalar_lea.hbm %s1533_s5, %s835_s17  ;;  %s1448_s7 = int_to_ptr.vmem [resolvable:$true] %s640_s7 }
  0x6f   : > { %844 = vmatprep.subr.bf16.mxu0 %v977_v3  ;;  %v982_v8 = vld [vmem:[#allocation5 + $0x18] sm:$0xff]   ;;  %v984_v10 = vld [vmem:[#allocation5 + $0x20] sm:$0xff]   ;;  %v985_v11 = vld [vmem:[#allocation5 + $0x68] sm:$0xff]   ;;  %s622_s18 = scalar_lea.sflag [#allocation4], %s1411_s13  ;;  %s1085_s30 = scalar_lea.vmem %s1448_s7, 128 }
  0x70   : > { %v316_v12 = vld [vmem:[%s1415_s12 + $0x8] sm:$0xff]  ;;  %v318_v13 = vld [vmem:[%s1415_s12 + $0x18] sm:$0xff]  ;;  %v991_v16 = vld [vmem:[#allocation7] sm:$0xff]   ;;  %p1086_p11 = scmp.ne.s32.totalorder %s1448_s7, %s1085_s30  ;;  %p1548_p0 = scmp.ne.s32.totalorder %s1543_s9, 0 }
  0x71   : > { %v986_v14 = vld [vmem:[#allocation5 + $0x28] sm:$0xff]   ;;  %v320_v15 = vpack.c.bf16 %v318_v13, %v316_v12  ;;  %v987_v17 = vld [vmem:[#allocation5 + $0x70] sm:$0xff]   ;;  %874 = vmatpush3.bf16.msra.mxu1 %v991_v16  ;;  %v989_v20 = vld [vmem:[#allocation5 + $0x78] sm:$0xff]   ;;  %s1198_s10 = smov [#allocation8]  }
  0x72   : > { %845 = vmatpush3.bf16.msra.mxu0 %v978_v4  ;;  %v992_v18 = vld [vmem:[#allocation7 + $0x8] sm:$0xff]   ;;  %875 = vmatprep.subr.bf16.mxu1 %v1196_v0  ;;  %v988_v19 = vld [vmem:[#allocation5 + $0x30] sm:$0xff]   ;;  %v990_v22 = vld [vmem:[#allocation5 + $0x38] sm:$0xff]   ;;  %p1087_p1 = pnand %p1086_p11, %p1548_p0  ;;  %s1089_s19 = sshll.u32 %s1198_s10, 4  ;;  %s1090_s19 = int_to_ptr.vmem [resolvable:$false] %s1089_s19 }
  0x73   : > { %846 = vmatprep.subr.bf16.mxu0 %v979_v5  ;;  %488 = vmatprep.mubr.bf16.mxu0 %v320_v15  ;;  %v993_v21 = vld [vmem:[#allocation7 + $0x10] sm:$0xff]   ;;  %v315_v23 = vld [vmem:[%s1415_s12] sm:$0xff]  ;;  %v994_v25 = vld [vmem:[#allocation7 + $0x18] sm:$0xff]   ;;  %p1092_p7 = scmp.lt.s32.totalorder %s1448_s7, %s1090_s19 }
  0x74   : > { %v317_v24 = vld [vmem:[%s1415_s12 + $0x10] sm:$0xff]  ;;  %v995_v27 = vld [vmem:[#allocation7 + $0x20] sm:$0xff]   ;;  %v996_v28 = vld [vmem:[#allocation7 + $0x28] sm:$0xff]   ;;  %p1088_p3 = pneg %p1087_p1  ;;  %s1091_s12 = scalar_lea.vmem %s1090_s19, 256 }
  0x75   : > { %876 = vmatpush3.bf16.msra.mxu1 %v992_v18  ;;  %v319_v26 = vpack.c.bf16 %v317_v24, %v315_v23  ;;  %v997_v29 = vld [vmem:[#allocation7 + $0x30] sm:$0xff]   ;;  %v998_v30 = vld [vmem:[#allocation7 + $0x38] sm:$0xff]   ;;  %v795_v35 = vld [vmem:[%s1530_s2] ss:$0 sm:$0xff]  ;;  %p1093_p9 = scmp.lt.s32.totalorder %s1091_s12, %s1085_s30 }
  0x76   : > { %847 = vmatpush3.bf16.msra.mxu0 %v980_v6  ;;  %877 = vmatprep.subr.bf16.mxu1 %v1196_v0 }
  0x77   : > { %848 = vmatprep.subr.bf16.mxu0 %v981_v7  ;;  %p1094_p12 = por %p1093_p9, %p1092_p7 }
  0x79   : > { %878 = vmatpush3.bf16.msra.mxu1 %v993_v21  ;;  %p1095_p2 = pnand %p1094_p12, %p1088_p3 }
  0x7a   : > { %849 = vmatpush3.bf16.msra.mxu0 %v982_v8  ;;  %879 = vmatprep.subr.bf16.mxu1 %v1196_v0 }
  0x7b   : > { %850 = vmatprep.subr.bf16.mxu0 %v983_v9 }
  0x7d   : > { %880 = vmatpush3.bf16.msra.mxu1 %v994_v25 }
  0x7e   : > { %851 = vmatpush3.bf16.msra.mxu0 %v984_v10  ;;  %881 = vmatprep.subr.bf16.mxu1 %v1196_v0 }
  0x7f   : > { %852 = vmatprep.subr.bf16.mxu0 %v985_v11 }
  0x81   : > { %882 = vmatpush3.bf16.msra.mxu1 %v995_v27 }
  0x82   : > { %853 = vmatpush3.bf16.msra.mxu0 %v986_v14  ;;  %883 = vmatprep.subr.bf16.mxu1 %v1196_v0 }
  0x83   : > { %854 = vmatprep.subr.bf16.mxu0 %v987_v17 }
  0x85   : > { %884 = vmatpush3.bf16.msra.mxu1 %v996_v28 }
  0x86   : > { %855 = vmatpush3.bf16.msra.mxu0 %v988_v19  ;;  %885 = vmatprep.subr.bf16.mxu1 %v1196_v0 }
  0x87   : > { %856 = vmatprep.subr.bf16.mxu0 %v989_v20 }
  0x89   : > { %886 = vmatpush3.bf16.msra.mxu1 %v997_v29 }
  0x8a   : > { %857 = vmatpush3.bf16.msra.mxu0 %v990_v22  ;;  %887 = vmatprep.subr.bf16.mxu1 %v1196_v0 }
  0x8d   : > { %489 = vmatmul.mubr.bf16.vlgmr.msra.gmra.mrb[0].mxu0 %v319_v26  ;;  %888 = vmatpush3.bf16.msra.mxu1 %v998_v30 }
 0x160   : > { %v858_v31 = vpop.f32.mrb[0].mxu0 }
 0x161   : > { %v859_v32 = vpop.f32.mrb[1].mxu0 }
 0x162   : > { %v860_v33 = vadd.f32 %v859_v32, %v858_v31  ;;  %v861_v34 = vpop.f32.mrb[2].mxu0 }
 0x163   : > { %v862_v36 = vpop.f32.mrb[3].mxu0 }
 0x164   : > { %v863_v37 = vadd.f32 %v862_v36, %v861_v34  ;;  %v491_v38 = vadd.f32 %v860_v33, %v795_v35 }
 0x166   : > { %v494_v39 = vadd.f32 %v863_v37, %v795_v35 }
 0x168   : > { %v497_v40 = vpack.c.bf16 %v494_v39, %v491_v38 }
 0x16a   : > { %841 = vst [vmem:[%s303_s16] sm:$0xff] %v497_v40   ;;  %890 = vmatmul.mubr.bf16.vlgmr.msra.gmra.mrb[0].mxu1 %v497_v40 }
 0x16b   : > { %1098 = shalt.err (!%p1095_p2)
}
 0x16c   : > { %s1099_s27 = scalar_lea.hbm %s1446_s8, 128  ;;  %s1103_s16 = scalar_lea.hbm %s1533_s5, 256 }
 0x16d   : > { %p1100_p13 = scmp.ne.s32.totalorder %s1446_s8, %s1099_s27  ;;  %p1104_p4 = scmp.lt.u32.totalorder %s1446_s8, %s1533_s5 }
 0x16e   : > { %p1105_p5 = scmp.lt.u32.totalorder %s1103_s16, %s1099_s27  ;;  %p1107_p11 = scmp.lt.u32.totalorder %s1099_s27, %s1446_s8 }
 0x16f   : > { %p1101_p6 = pnand %p1100_p13, %p1548_p0 }
 0x170   : > { %p1106_p8 = por %p1105_p5, %p1104_p4 }
 0x171   : > { %p1102_p10 = pneg %p1101_p6 }
 0x172   : > { %p1108_p1 = por %p1107_p11, %p1106_p8 }
 0x174   : > { %p1109_p3 = pnand %p1108_p1, %p1102_p10 }
 0x176   : > { %1112 = shalt.err (!%p1109_p3)
}
 0x177   : > { %s1199_s15 = smov 64   ;;  %s1200_s30 = smov 4   ;;  %v814_v41 = vld [vmem:[%s1532_s4] ss:$0 sm:$0xff] }
 0x178   : > { %903 = dma.vmem_to_hbm [thread:$0]  (%p1548_p0), %s1448_s7, 128, %s1446_s8, %s622_s18, %s1199_s15, %s1199_s15, %s1200_s30  }
 0x179   : > { %s794_s10 = sshll.u32 %s1411_s13, 4  ;;  %s836_s14 = sshll.u32 %s1260_s25, 8 }
 0x17a   : > { %s310_s27 = scalar_lea.vmem [#allocation9], %s794_s10  ;;  %s1484_s18 = scalar_lea.hbm %s1534_s6, %s836_s14 }
 0x17b   : > { %s656_s29 = sshll.u32 %s310_s27, 4  ;;  %s627_s16 = scalar_lea.sflag [#allocation10], %s1411_s13  ;;  %s1479_s29 = int_to_ptr.vmem [resolvable:$true] %s656_s29 }
 0x17c   : > { %s1113_s17 = scalar_lea.vmem %s1479_s29, 256  ;;  %s1201_s25 = smov [#allocation9]  }
 0x17d   : > { %p1114_p7 = scmp.ne.s32.totalorder %s1479_s29, %s1113_s17  ;;  %s1117_s20 = sshll.u32 %s1201_s25, 4  ;;  %s1118_s20 = int_to_ptr.vmem [resolvable:$false] %s1117_s20 }
 0x17e   : > { %s1119_s15 = scalar_lea.vmem %s1118_s20, 512  ;;  %p1120_p2 = scmp.lt.s32.totalorder %s1479_s29, %s1118_s20 }
 0x17f   : > { %p1115_p9 = pnand %p1114_p7, %p1548_p0  ;;  %p1121_p13 = scmp.lt.s32.totalorder %s1119_s15, %s1113_s17 }
 0x181   : > { %p1116_p12 = pneg %p1115_p9  ;;  %p1122_p6 = por %p1121_p13, %p1120_p2 }
 0x183   : > { %p1123_p10 = pnand %p1122_p6, %p1116_p12 }
 0x23d   : > { %v612_v42 = vpop.f32.mrb[0].mxu1 }
 0x23e   : > { %v613_v43 = vadd.f32 %v814_v41, %v612_v42  ;;  %v891_v44 = vpop.f32.mrb[1].mxu1 }
 0x23f   : > { %v615_v45 = vpop.f32.mrb[2].mxu1 }
 0x240   : > { %619 = vst [vmem:[%s310_s27] sm:$0xff] %v613_v43  ;;  %v616_v46 = vadd.f32 %v814_v41, %v615_v45  ;;  %v892_v47 = vpop.f32.mrb[3].mxu1 }
 0x242   : > { %620 = vst [vmem:[%s310_s27 + $0x8] sm:$0xff] %v616_v46 }
 0x243   : > { %1126 = shalt.err (!%p1123_p10)
}
 0x244   : > { %s1127_s30 = scalar_lea.hbm %s1484_s18, 256  ;;  %s1131_s12 = scalar_lea.hbm %s1534_s6, 512 }
 0x245   : > { %p1128_p4 = scmp.ne.s32.totalorder %s1484_s18, %s1127_s30  ;;  %p1132_p11 = scmp.lt.u32.totalorder %s1484_s18, %s1534_s6 }
 0x246   : > { %p1133_p1 = scmp.lt.u32.totalorder %s1131_s12, %s1127_s30  ;;  %p1135_p7 = scmp.lt.u32.totalorder %s1127_s30, %s1484_s18 }
 0x247   : > { %p1129_p5 = pnand %p1128_p4, %p1548_p0 }
 0x248   : > { %p1134_p3 = por %p1133_p1, %p1132_p11 }
 0x249   : > { %p1130_p8 = pneg %p1129_p5 }
 0x24a   : > { %p1136_p9 = por %p1135_p7, %p1134_p3 }
 0x24c   : > { %p1137_p12 = pnand %p1136_p9, %p1130_p8 }
 0x24e   : > { %1140 = shalt.err (!%p1137_p12)
}
 0x24f   : > { %s1202_s7 = smov 128   ;;  %s1203_s8 = smov 8  }
 0x250   : > { %904 = dma.vmem_to_hbm [thread:$0]  (%p1548_p0), %s1479_s29, 256, %s1484_s18, %s627_s16, %s1202_s7, %s1202_s7, %s1203_s8  }
 0x251 PF: > { %s671_s17 = sand.u32 1, %s1175_s21   ;;  %p1549_p2 = scmp.ne.s32.totalorder %s1539_s28, 0 }
 0x252   : > { %p1550_p13 = scmp.ge.s32.totalorder %s1187_s24, 2  ;;  %s672_s25 = scalar_lea.sflag [#allocation4], %s671_s17 }
 0x254   : > { %p919_p6 = pnand %p1550_p13, %p1549_p2 }
 0x256   : > { %1166 = dma.done.wait (!%p919_p6), %s672_s25, 128  }
 0x257   : > { %1168 = vsyncadd (!%p919_p6), %s672_s25, 4294967168  ;;  %s681_s20 = scalar_lea.sflag [#allocation10], %s671_s17 }
 0x258   : > { %1170 = dma.done.wait (!%p919_p6), %s681_s20, 256  }
 0x259   : > { %1172 = vsyncadd (!%p919_p6), %s681_s20, 4294967040  ;;  %p24_p0 = scmp.ge.s32.totalorder %s1349_s26, 4   ;;  %s1551_s21 = smov %s1179_s22 }
 0x25a   : > { %s1552_s22 = smov %s1183_s23  ;;  %s1553_s23 = smov %s1365_s11 }
 0x25b   : > { %s1554_s24 = smov %s1349_s26  ;;  %26 = sbr.rel (!%p24_p0) target bundleno = 8 (0x8), region = 110 }
 0x262   :  { %686 = vsyncpa [#allocation3], 1 }
 0x263   :  { %688 = vsyncpa [#allocation3 + $0x1], 1 }
 0x264   :  { %689 = vsyncpa [#allocation6], 1 }
 0x265   :  { %690 = vsyncpa [#allocation4], 1 }
 0x266   :  { %692 = vsyncpa [#allocation4 + $0x1], 1 }
 0x267   :  { %693 = vsyncpa [#allocation10], 1 }
 0x268   :  { %695 = vsyncpa [#allocation10 + $0x1], 1 }

</bundles_post_ra>
